<compile_context>
chip_gen: v7x
topology: tpu7x:2x2x1
jax: 0.10.0
libtpu: 0.0.40
codegen_flags: <defaults>
</compile_context>

<pallas_src>
import jax
import jax.numpy as jnp
from jax.experimental import pallas as pl
from jax.experimental.pallas import tpu as pltpu


def se_kernel(x_ref, w1t_ref, w2t_ref, o_ref):
    # x_ref  : (Bt, HW, C) in the I/O dtype (f32 or bf16), channels on lanes
    # w1t_ref: (C, Cr) f32  -- fc1 weight, transposed, pre-scaled by 1/HW
    # w2t_ref: (Cr, C) f32  -- fc2 weight, transposed
    x = x_ref[...]
    # Squeeze: global spatial sum with f32 accumulation (1/HW folded into w1t).
    s = jnp.sum(x, axis=1, dtype=jnp.float32)                           # (Bt, C)
    # fc1 (1x1 conv, no bias) + ReLU -- batched matmul, f32 accumulation.
    h = jnp.dot(s, w1t_ref[...], preferred_element_type=jnp.float32)    # (Bt, Cr)
    h = jnp.maximum(h, 0.0)
    # fc2 (1x1 conv, no bias) + sigmoid.
    g = jax.nn.sigmoid(
        jnp.dot(h, w2t_ref[...], preferred_element_type=jnp.float32))   # (Bt, C)
    # Excitation: single-upcast path -- cast the gate once to the I/O dtype and
    # broadcast it over the HW sublane dim (no relayout needed).
    # TODO(synk): on v5e (no bf16 VPU datapath) an f32 multiply is marginally
    # cheaper for bf16 I/O; the op is HBM-bound so it is not worth a branch.
    gate = g.astype(x.dtype)
    o_ref[...] = (x * gate[:, None, :]).astype(o_ref.dtype)


def _round_up(v, m):
    return ((v + m - 1) // m) * m


def _vmem_plan(B, C, Cr, HW, io_itemsize):
    """Pick the batch tile Bt and the scoped-VMEM limit for this generation."""
    try:
        capacity = int(pltpu.get_tpu_info().vmem_capacity_bytes)
    except Exception:
        capacity = 64 * 1024 * 1024          # conservative: fits every generation

    # (8,128)-tile-padded footprint of one image's (HW, C) slab in the I/O dtype.
    hw_p = _round_up(HW, 8)
    c_p = _round_up(C, 128)
    io_tile = hw_p * c_p * io_itemsize
    # Per image per grid step: input + output blocks, each double-buffered by
    # the pipeline, plus slack for the f32 gate / squeeze vectors.
    per_image = 4 * io_tile + 4 * c_p * 4

    budget = int(0.70 * capacity)            # ~46 MiB on v7x, ~90 MiB on v5e/v6e
    bt = max(1, min(B, budget // max(per_image, 1)))

    # v7x (64 MiB VMEM per TC, 2 TensorCores): keep >= 2 grid steps so the
    # "parallel" batch axis can be split across the cores.  Single-TC
    # generations (128 MiB VMEM) must not pay this block-size cut.
    if capacity < 100 * 1024 * 1024 and B >= 2:
        bt = min(bt, max(1, (B + 1) // 2))

    # Both (tiny) FC weights, double-buffered, f32, tile-padded.
    weights_bytes = 2 * 4 * (_round_up(C, 8) * _round_up(Cr, 128)
                             + _round_up(Cr, 8) * _round_up(C, 128))
    need = bt * per_image + weights_bytes + (2 << 20)
    vmem_limit = min(int(0.90 * capacity), max(need, 32 * 1024 * 1024))
    return bt, int(vmem_limit)


def se_module(x_nchw, w1, w2, max_bt=None):
    """SEModule forward. x_nchw: (B, C, H, W); w1: (C//r, C); w2: (C, C//r).
    Returns the same shape/dtype as x_nchw."""
    B, C, H, W = x_nchw.shape
    Cr = w1.shape[0]
    HW = H * W

    # Channels-last for the kernel: (B, HW, C).  In a full NHWC network these
    # two transposes disappear; they only keep the PyTorch NCHW interface here.
    x_cl = jnp.transpose(x_nchw, (0, 2, 3, 1)).reshape(B, HW, C)

    # Fold the 1/HW of the global average pool into fc1's weight and
    # pre-transpose both weights so the in-kernel FCs are (Bt,C)@(C,Cr) and
    # (Bt,Cr)@(Cr,C) with the contraction dim on lanes.
    w1t = (w1.astype(jnp.float32) * (1.0 / HW)).T   # (C, Cr)
    w2t = w2.astype(jnp.float32).T                  # (Cr, C)

    bt, vmem_limit = _vmem_plan(B, C, Cr, HW, x_nchw.dtype.itemsize)
    if max_bt is not None:
        bt = max(1, min(bt, max_bt))

    out_cl = pl.pallas_call(
        se_kernel,
        out_shape=jax.ShapeDtypeStruct((B, HW, C), x_nchw.dtype),
        grid_spec=pltpu.PrefetchScalarGridSpec(
            num_scalar_prefetch=0,
            grid=(pl.cdiv(B, bt),),          # ragged tail is masked on writeback
            in_specs=[
                # Full (HW, C) trailing dims per block -> (8,128) rule satisfied
                # for any HW/C; C on lanes -> dense, unmasked stores.
                pl.BlockSpec((bt, HW, C), lambda b: (b, 0, 0)),
                pl.BlockSpec((C, Cr), lambda b: (0, 0)),
                pl.BlockSpec((Cr, C), lambda b: (0, 0)),
            ],
            out_specs=pl.BlockSpec((bt, HW, C), lambda b: (b, 0, 0)),
        ),
        compiler_params=pltpu.CompilerParams(
            dimension_semantics=("parallel",),
            vmem_limit_bytes=vmem_limit,
        ),
    )(x_cl, w1t, w2t)

    return jnp.transpose(out_cl.reshape(B, H, W, C), (0, 3, 1, 2))


def se_ref(x, w1, w2):
    # Pure-JAX reference mirroring the PyTorch forward (math in f32).
    xf = x.astype(jnp.float32)
    s = jnp.mean(xf, axis=(2, 3), keepdims=True)                    # (B,C,1,1)
    h = jnp.maximum(jnp.einsum("oc,bcxy->boxy", w1, s), 0.0)        # (B,Cr,1,1)
    g = jax.nn.sigmoid(jnp.einsum("co,boxy->bcxy", w2, h))          # (B,C,1,1)
    return xf * g


if __name__ == "__main__":
    B, C, H, W = 2, 4, 16, 16
    reduction = 2
    Cr = C // reduction

    key = jax.random.PRNGKey(0)
    kx, k1, k2 = jax.random.split(key, 3)
    x = jax.random.normal(kx, (B, C, H, W), dtype=jnp.float32)
    # Conv2d kernel_size=1, bias=False -> plain matrices.
    w1 = jax.random.normal(k1, (Cr, C), dtype=jnp.float32) * (1.0 / jnp.sqrt(C))
    w2 = jax.random.normal(k2, (C, Cr), dtype=jnp.float32) * (1.0 / jnp.sqrt(Cr))

    # f32 I/O path: must match the reference tightly.
    out = jax.block_until_ready(se_module(x, w1, w2))
    expected = se_ref(x, w1, w2)
    assert out.shape == (B, C, H, W)
    assert out.dtype == x.dtype
    assert jnp.allclose(out, expected, atol=1e-5, rtol=1e-5)

    # bf16 I/O path (halved HBM traffic); squeeze/FCs/sigmoid stay f32 in-kernel.
    x_bf16 = x.astype(jnp.bfloat16)
    out_bf16 = jax.block_until_ready(se_module(x_bf16, w1, w2))
    expected_bf16 = se_ref(x_bf16, w1, w2)   # f32 math on the bf16-cast input
    assert out_bf16.dtype == jnp.bfloat16
    assert jnp.allclose(out_bf16.astype(jnp.float32), expected_bf16,
                        atol=2e-2, rtol=2e-2)

    # Ragged batch (odd B, forced small tile) exercises grid = cdiv(B, Bt) with
    # a masked partial last block.
    xb3 = jax.random.normal(jax.random.PRNGKey(1), (3, C, H, W), dtype=jnp.float32)
    out3 = jax.block_until_ready(se_module(xb3, w1, w2, max_bt=2))
    assert jnp.allclose(out3, se_ref(xb3, w1, w2), atol=1e-5, rtol=1e-5)

    print("KERNEL_OK")
</pallas_src>

<mosaic_0001>
module attributes {stable_mosaic.version = 11 : i64} {
  func.func @se_kernel(%arg0: i32, %arg1: memref<1x256x4xf32, #tpu.memory_space<vmem>>, %arg2: memref<4x2xf32, #tpu.memory_space<vmem>>, %arg3: memref<2x4xf32, #tpu.memory_space<vmem>>, %arg4: memref<1x256x4xf32, #tpu.memory_space<vmem>>) attributes {dimension_semantics = [#tpu.dimension_semantics<parallel>], iteration_bounds = array<i64: 2>, scalar_prefetch = 0 : i64, scratch_operands = 0 : i64, tpu.core_type = #tpu.core_type<tc>, window_params = [{transform_indices = @transform_0, window_bounds = array<i64: 1, 256, 4>}, {pipeline_mode = #tpu.pipeline_mode<synchronous>, transform_indices = @transform_1, window_bounds = array<i64: 4, 2>}, {pipeline_mode = #tpu.pipeline_mode<synchronous>, transform_indices = @transform_2, window_bounds = array<i64: 2, 4>}, {transform_indices = @transform_3, window_bounds = array<i64: 1, 256, 4>}]} {
    %c0 = arith.constant 0 : index
    %c0_0 = arith.constant 0 : index
    %c0_1 = arith.constant 0 : index
    %0 = vector.load %arg1[%c0, %c0_0, %c0_1] : memref<1x256x4xf32, #tpu.memory_space<vmem>>, vector<1x256x4xf32>
    %cst = arith.constant dense<0.000000e+00> : vector<1x4xf32>
    %1 = vector.multi_reduction <add>, %0, %cst [1] : vector<1x256x4xf32> to vector<1x4xf32>
    %c0_2 = arith.constant 0 : index
    %c0_3 = arith.constant 0 : index
    %2 = vector.load %arg2[%c0_2, %c0_3] : memref<4x2xf32, #tpu.memory_space<vmem>>, vector<4x2xf32>
    %cst_4 = arith.constant dense<0.000000e+00> : vector<1x2xf32>
    %3 = tpu.matmul %1, %2, %cst_4 {dimension_numbers = #tpu.dot_dimension_numbers<[1], [0], [0], [1], [0, 0, 1, 1], [], []>} : vector<1x4xf32>, vector<4x2xf32>, vector<1x2xf32> -> vector<1x2xf32>
    %cst_5 = arith.constant 0.000000e+00 : f32
    %4 = vector.broadcast %cst_5 : f32 to vector<1x2xf32>
    %5 = arith.maximumf %3, %4 : vector<1x2xf32>
    %c0_6 = arith.constant 0 : index
    %c0_7 = arith.constant 0 : index
    %6 = vector.load %arg3[%c0_6, %c0_7] : memref<2x4xf32, #tpu.memory_space<vmem>>, vector<2x4xf32>
    %cst_8 = arith.constant dense<0.000000e+00> : vector<1x4xf32>
    %7 = tpu.matmul %5, %6, %cst_8 {dimension_numbers = #tpu.dot_dimension_numbers<[1], [0], [0], [1], [0, 0, 1, 1], [], []>} : vector<1x2xf32>, vector<2x4xf32>, vector<1x4xf32> -> vector<1x4xf32>
    %8 = arith.negf %7 : vector<1x4xf32>
    %9 = math.exp %8 : vector<1x4xf32>
    %cst_9 = arith.constant 1.000000e+00 : f32
    %10 = vector.broadcast %cst_9 : f32 to vector<1x4xf32>
    %11 = arith.addf %10, %9 : vector<1x4xf32>
    %12 = arith.divf %10, %11 : vector<1x4xf32>
    %13 = vector.shape_cast %12 : vector<1x4xf32> to vector<1x1x4xf32>
    %14 = vector.broadcast %13 : vector<1x1x4xf32> to vector<1x256x4xf32>
    %15 = arith.mulf %0, %14 : vector<1x256x4xf32>
    %c0_10 = arith.constant 0 : index
    %c0_11 = arith.constant 0 : index
    %c0_12 = arith.constant 0 : index
    %16 = vector.load %arg4[%c0_10, %c0_11, %c0_12] : memref<1x256x4xf32, #tpu.memory_space<vmem>>, vector<1x256x4xf32>
    tpu.vector_store %arg4[%c0_10, %c0_11, %c0_12], %15 {strides = array<i32>} : memref<1x256x4xf32, #tpu.memory_space<vmem>>, vector<1x256x4xf32>,
    return
  }
  func.func @transform_0(%arg0: i32) -> (i32, i32, i32) {
    %c0_i32 = arith.constant 0 : i32
    %c0_i32_0 = arith.constant 0 : i32
    %c0_i32_1 = arith.constant 0 : i32
    return %arg0, %c0_i32, %c0_i32_0 : i32, i32, i32
  }
  func.func @transform_1(%arg0: i32) -> (i32, i32) {
    %c0_i32 = arith.constant 0 : i32
    %c0_i32_0 = arith.constant 0 : i32
    %c0_i32_1 = arith.constant 0 : i32
    return %c0_i32, %c0_i32_0 : i32, i32
  }
  func.func @transform_2(%arg0: i32) -> (i32, i32) {
    %c0_i32 = arith.constant 0 : i32
    %c0_i32_0 = arith.constant 0 : i32
    %c0_i32_1 = arith.constant 0 : i32
    return %c0_i32, %c0_i32_0 : i32, i32
  }
  func.func @transform_3(%arg0: i32) -> (i32, i32, i32) {
    %c0_i32 = arith.constant 0 : i32
    %c0_i32_0 = arith.constant 0 : i32
    %c0_i32_1 = arith.constant 0 : i32
    return %arg0, %c0_i32, %c0_i32_0 : i32, i32, i32
  }
}

</mosaic_0001>

<bundles_post_ra>
// kernel: tpu_custom_call.1
= control target key start
LH: loop header
LB: loop body
LE: loop exit
PB: predicated region body
PF: predicated region fallthrough
CT: control target
= control target key end

     0   :  { %s636_s12 = smov 0   ;;  %s927_s0 = inlined_call_operand.vmem [shape: f32[2,256,4], index: 0, kind: input, shape index: {}]   ;;  %s928_s1 = inlined_call_operand.vmem [shape: f32[4,2], index: 1, kind: input, shape index: {}]   ;;  %s929_s2 = inlined_call_operand.vmem [shape: f32[2,4], index: 2, kind: input, shape index: {}]   ;;  %s930_s3 = inlined_call_operand.vmem [shape: f32[2,256,4], index: 3, kind: output, shape index: {}]  }
   0x1 LB: > { %s560_s13 = sadd.s32 4294967295, %s612_s12   ;;  %p564_p0 = scmp.ge.s32.totalorder %s612_s12, 1  ;;  %s612_s12 = sphi %s636_s12, %s13_s12  }
   0x2   : > { %p137_p1 = scmp.lt.s32.totalorder %s612_s12, 3 }
   0x4   : > { %p138_p2 = pnand %p564_p0, %p137_p1 }
   0x5   : > { %v273_v0 = vld [vmem:[%s928_s1] sm:$0xf] (!%p138_p2)  ;;  %vm277_vm0 = vcmask (!%p138_p2), 1043456   ;;  %p161_p3 = scmp.lt.s32.totalorder (!%p138_p2), %s560_s13, 1  ;;  %v614_v1 = vmov (!%p138_p2), 0.0   ;;  %vm615_vm1 = vmmov (!%p138_p2), 0  }
   0x6   : > { %141 = sbr.rel (%p138_p2) target bundleno = 565 (0x235), region = 32  ;;  %582 = vmatprep.subr.mxu0 (!%p138_p2), %v614_v1  ;;  %584 = vmatprep.mubr.msk.f32.mxu0 (!%p138_p2), %vm615_vm1, %v614_v1  ;;  %vm203_vm2 = vcmask (!%p138_p2), 31744   ;;  %vm357_vm3 = vcmask (!%p138_p2), 1041408   ;;  %vm353_vm4 = vcmask (!%p138_p2), 15360  }
   0x7   : > { %583 = vmatpush3.msk.msra.mxu0 (!%p138_p2), %vm277_vm0, %v273_v0  ;;  %587 = vmatprep.subr.mxu1 (!%p138_p2), %v614_v1 }
   0x8   : > { %589 = vmatprep.mubr.msk.f32.mxu1 (!%p138_p2), %vm615_vm1, %v614_v1 }
   0xd   : > { %s932_s13 = smov (!%p161_p3, %s560_s13), 1 }
   0xe   : > { %s576_s16 = sshll.u32 %s932_s13, 8 }
   0xf   : > { %s655_s19 = scalar_lea.vmem %s927_s0, %s576_s16  ;;  %s826_s24 = scalar_lea.vmem %s930_s3, %s576_s16 }
  0x10   : > { %v658_v2 = vld [vmem:[%s655_s19] sm:$0xff]  ;;  %v661_v3 = vld [vmem:[%s655_s19 + $0x8] sm:$0xff]  ;;  %v664_v4 = vld [vmem:[%s655_s19 + $0x10] sm:$0xff] }
  0x11   : > { %v667_v5 = vld [vmem:[%s655_s19 + $0x18] sm:$0xff]  ;;  %v204_v6 = vsel %vm203_vm2, %v658_v2, 0.0  ;;  %v205_v7 = vsel %vm203_vm2, %v661_v3, 0.0  ;;  %v207_v8 = vsel %vm203_vm2, %v664_v4, 0.0  ;;  %v676_v9 = vld [vmem:[%s655_s19 + $0x20] sm:$0xff]  ;;  %v681_v12 = vld [vmem:[%s655_s19 + $0x28] sm:$0xff] }
  0x12   : > { %v206_v10 = vadd.f32 %v205_v7, %v204_v6  ;;  %v209_v11 = vsel %vm203_vm2, %v667_v5, 0.0  ;;  %v211_v14 = vsel %vm203_vm2, %v676_v9, 0.0  ;;  %v686_v15 = vld [vmem:[%s655_s19 + $0x30] sm:$0xff]  ;;  %v213_v17 = vsel %vm203_vm2, %v681_v12, 0.0  ;;  %v691_v18 = vld [vmem:[%s655_s19 + $0x38] sm:$0xff]  ;;  %v696_v21 = vld [vmem:[%s655_s19 + $0x40] sm:$0xff] }
  0x13   : > { %v215_v20 = vsel %vm203_vm2, %v686_v15, 0.0  ;;  %v217_v23 = vsel %vm203_vm2, %v691_v18, 0.0  ;;  %v701_v24 = vld [vmem:[%s655_s19 + $0x48] sm:$0xff]  ;;  %v219_v26 = vsel %vm203_vm2, %v696_v21, 0.0  ;;  %v706_v27 = vld [vmem:[%s655_s19 + $0x50] sm:$0xff]  ;;  %v711_v30 = vld [vmem:[%s655_s19 + $0x58] sm:$0xff] }
  0x14   : > { %v208_v13 = vadd.f32 %v207_v8, %v206_v10  ;;  %v221_v29 = vsel %vm203_vm2, %v701_v24, 0.0  ;;  %v223_v32 = vsel %vm203_vm2, %v706_v27, 0.0  ;;  %v716_v33 = vld [vmem:[%s655_s19 + $0x60] sm:$0xff]  ;;  %v225_v35 = vsel %vm203_vm2, %v711_v30, 0.0  ;;  %v721_v36 = vld [vmem:[%s655_s19 + $0x68] sm:$0xff]  ;;  %v726_v39 = vld [vmem:[%s655_s19 + $0x70] sm:$0xff] }
  0x15   : > { %v227_v38 = vsel %vm203_vm2, %v716_v33, 0.0  ;;  %v229_v41 = vsel %vm203_vm2, %v721_v36, 0.0  ;;  %v731_v42 = vld [vmem:[%s655_s19 + $0x78] sm:$0xff]  ;;  %v231_v44 = vsel %vm203_vm2, %v726_v39, 0.0  ;;  %v736_v45 = vld [vmem:[%s655_s19 + $0x80] sm:$0xff]  ;;  %v741_v48 = vld [vmem:[%s655_s19 + $0x88] sm:$0xff] }
  0x16   : > { %v210_v16 = vadd.f32 %v209_v11, %v208_v13  ;;  %v233_v47 = vsel %vm203_vm2, %v731_v42, 0.0  ;;  %v235_v50 = vsel %vm203_vm2, %v736_v45, 0.0  ;;  %v746_v51 = vld [vmem:[%s655_s19 + $0x90] sm:$0xff]  ;;  %v237_v53 = vsel %vm203_vm2, %v741_v48, 0.0  ;;  %v751_v54 = vld [vmem:[%s655_s19 + $0x98] sm:$0xff]  ;;  %v756_v57 = vld [vmem:[%s655_s19 + $0xa0] sm:$0xff] }
  0x17   : > { %v239_v56 = vsel %vm203_vm2, %v746_v51, 0.0  ;;  %v241_v59 = vsel %vm203_vm2, %v751_v54, 0.0  ;;  %v761_v60 = vld [vmem:[%s655_s19 + $0xa8] sm:$0xff]  ;;  %v243_v62 = vsel %vm203_vm2, %v756_v57, 0.0  ;;  %v766_v63 = vld [vmem:[%s655_s19 + $0xb0] sm:$0xff]  ;;  %v771_v6 = vld [vmem:[%s655_s19 + $0xb8] sm:$0xff] }
  0x18   : > { %v212_v19 = vadd.f32 %v211_v14, %v210_v16  ;;  %v245_v1 = vsel %vm203_vm2, %v761_v60, 0.0  ;;  %v247_v8 = vsel %vm203_vm2, %v766_v63, 0.0  ;;  %v776_v10 = vld [vmem:[%s655_s19 + $0xc0] sm:$0xff]  ;;  %v249_v13 = vsel %vm203_vm2, %v771_v6, 0.0  ;;  %v781_v14 = vld [vmem:[%s655_s19 + $0xc8] sm:$0xff] }
  0x1a   : > { %v214_v22 = vadd.f32 %v213_v17, %v212_v19  ;;  %v251_v17 = vsel %vm203_vm2, %v776_v10, 0.0  ;;  %v786_v19 = vld [vmem:[%s655_s19 + $0xd0] sm:$0xff] }
  0x1c   : > { %v216_v25 = vadd.f32 %v215_v20, %v214_v22  ;;  %v253_v22 = vsel %vm203_vm2, %v781_v14, 0.0 }
  0x1e   : > { %v218_v28 = vadd.f32 %v217_v23, %v216_v25  ;;  %v791_v23 = vld [vmem:[%s655_s19 + $0xd8] sm:$0xff] }
  0x20   : > { %v220_v31 = vadd.f32 %v219_v26, %v218_v28  ;;  %v255_v26 = vsel %vm203_vm2, %v786_v19, 0.0  ;;  %v796_v28 = vld [vmem:[%s655_s19 + $0xe0] sm:$0xff] }
  0x22   : > { %v222_v34 = vadd.f32 %v221_v29, %v220_v31  ;;  %v257_v31 = vsel %vm203_vm2, %v791_v23, 0.0 }
  0x24   : > { %v224_v37 = vadd.f32 %v223_v32, %v222_v34  ;;  %v801_v32 = vld [vmem:[%s655_s19 + $0xe8] sm:$0xff] }
  0x26   : > { %v226_v40 = vadd.f32 %v225_v35, %v224_v37  ;;  %v259_v35 = vsel %vm203_vm2, %v796_v28, 0.0  ;;  %v806_v37 = vld [vmem:[%s655_s19 + $0xf0] sm:$0xff] }
  0x28   : > { %v228_v43 = vadd.f32 %v227_v38, %v226_v40  ;;  %v261_v40 = vsel %vm203_vm2, %v801_v32, 0.0 }
  0x2a   : > { %v230_v46 = vadd.f32 %v229_v41, %v228_v43  ;;  %v811_v41 = vld [vmem:[%s655_s19 + $0xf8] sm:$0xff] }
  0x2c   : > { %v232_v49 = vadd.f32 %v231_v44, %v230_v46  ;;  %v263_v44 = vsel %vm203_vm2, %v806_v37, 0.0 }
  0x2e   : > { %v234_v52 = vadd.f32 %v233_v47, %v232_v49  ;;  %v265_v47 = vsel %vm203_vm2, %v811_v41, 0.0 }
  0x30   : > { %v236_v55 = vadd.f32 %v235_v50, %v234_v52 }
  0x32   : > { %v238_v58 = vadd.f32 %v237_v53, %v236_v55 }
  0x34   : > { %v240_v61 = vadd.f32 %v239_v56, %v238_v58 }
  0x36   : > { %v242_v0 = vadd.f32 %v241_v59, %v240_v61  ;;  %v352_v61 = vld [vmem:[%s929_s2] sm:$0x3] }
  0x37   : > { %588 = vmatpush3.msk.msra.mxu1 %vm357_vm3, %v352_v61 }
  0x38   : > { %v244_v7 = vadd.f32 %v243_v62, %v242_v0 }
  0x3a   : > { %v246_v11 = vadd.f32 %v245_v1, %v244_v7 }
  0x3c   : > { %v248_v16 = vadd.f32 %v247_v8, %v246_v11 }
  0x3e   : > { %v250_v20 = vadd.f32 %v249_v13, %v248_v16 }
  0x40   : > { %v252_v25 = vadd.f32 %v251_v17, %v250_v20  ;;  %v437_v17 = vlaneseq }
  0x42   : > { %v254_v29 = vadd.f32 %v253_v22, %v252_v25  ;;  %v438_v20 = vshrl.u32 %v437_v17, 7 }
  0x44   : > { %v256_v34 = vadd.f32 %v255_v26, %v254_v29  ;;  %v439_v22 = vsub.s32 0, %v438_v20 }
  0x46   : > { %v258_v38 = vadd.f32 %v257_v31, %v256_v34 }
  0x48   : > { %v260_v43 = vadd.f32 %v259_v35, %v258_v38 }
  0x4a   : > { %v262_v46 = vadd.f32 %v261_v40, %v260_v43 }
  0x4c   : > { %v264_v49 = vadd.f32 %v263_v44, %v262_v46 }
  0x4e   : > { %v266_v50 = vadd.f32 %v265_v47, %v264_v49 }
  0x50   : > { %v267_v52 = vrot.slane %v266_v50, 4 }
  0x52   : > { %v268_v53 = vadd.f32 %v267_v52, %v266_v50 }
  0x54   : > { %v269_v55 = vrot.slane %v268_v53, 2 }
  0x56   : > { %v270_v56 = vadd.f32 %v269_v55, %v268_v53 }
  0x58   : > { %v271_v58 = vrot.slane %v270_v56, 1 }
  0x5a   : > { %v272_v59 = vadd.f32 %v271_v58, %v270_v56 }
  0x5c   : > { %585 = vmatmul.mubr.msk.f32.vlgmr.msra.gmra.mrb[0].mxu0 %vm203_vm2, %v272_v59 }
 0x12f   : > { %v347_v62 = vpop.f32.mrb[0].mxu0 }
 0x130   : > { %v351_v0 = vmax.f32 %v347_v62, 0.0  ;;  %v586_v1 = vpop.f32.mrb[1].mxu0 }
 0x132   : > { %590 = vmatmul.mubr.msk.f32.vlgmr.msra.gmra.mrb[0].mxu1 %vm353_vm4, %v351_v0 }
 0x205   : > { %v427_v7 = vpop.f32.mrb[0].mxu1 }
 0x206   : > { %v573_v8 = vmul.f32 -1.442695, %v427_v7  ;;  %v591_v11 = vpop.f32.mrb[1].mxu1 }
 0x208   : > { %602 = vpow2.f32 %v573_v8 }
 0x212   : > { %v603_v13 = vpop.eup %602 }
 0x213   : > { %v434_v16 = vadd.f32 1.0, %v603_v13 }
 0x215   : > { %604 = vrcp.f32 %v434_v16 }
 0x21f   : > { %v605_v25 = vpop.eup %604 }
 0x220   : > { %v440_v26 = vrot.slane %v605_v25, %v439_v22 }
 0x222   : > { %v441_v29 = vmul.f32 %v440_v26, %v658_v2  ;;  %v442_v31 = vmul.f32 %v440_v26, %v661_v3  ;;  %v443_v34 = vmul.f32 %v440_v26, %v664_v4  ;;  %v444_v35 = vmul.f32 %v440_v26, %v667_v5 }
 0x223   : > { %v445_v38 = vmul.f32 %v440_v26, %v676_v9  ;;  %v446_v40 = vmul.f32 %v440_v26, %v681_v12  ;;  %v447_v43 = vmul.f32 %v440_v26, %v686_v15  ;;  %v448_v44 = vmul.f32 %v440_v26, %v691_v18 }
 0x224   : > { %v449_v2 = vmul.f32 %v440_v26, %v696_v21  ;;  %v450_v3 = vmul.f32 %v440_v26, %v701_v24  ;;  %v451_v4 = vmul.f32 %v440_v26, %v706_v27  ;;  %v452_v5 = vmul.f32 %v440_v26, %v711_v30  ;;  %473 = vst.msk [vmem:[%s826_s24] sm:$0xff] %vm203_vm2, %v441_v29 }
 0x225   : > { %474 = vst.msk [vmem:[%s826_s24 + $0x8] sm:$0xff] %vm203_vm2, %v442_v31  ;;  %475 = vst.msk [vmem:[%s826_s24 + $0x10] sm:$0xff] %vm203_vm2, %v443_v34  ;;  %v453_v9 = vmul.f32 %v440_v26, %v716_v33  ;;  %v454_v12 = vmul.f32 %v440_v26, %v721_v36  ;;  %v455_v15 = vmul.f32 %v440_v26, %v726_v39 }
 0x226   : > { %476 = vst.msk [vmem:[%s826_s24 + $0x18] sm:$0xff] %vm203_vm2, %v444_v35  ;;  %v456_v18 = vmul.f32 %v440_v26, %v731_v42  ;;  %477 = vst.msk [vmem:[%s826_s24 + $0x20] sm:$0xff] %vm203_vm2, %v445_v38  ;;  %v457_v21 = vmul.f32 %v440_v26, %v736_v45  ;;  %v458_v24 = vmul.f32 %v440_v26, %v741_v48 }
 0x227   : > { %478 = vst.msk [vmem:[%s826_s24 + $0x28] sm:$0xff] %vm203_vm2, %v446_v40  ;;  %479 = vst.msk [vmem:[%s826_s24 + $0x30] sm:$0xff] %vm203_vm2, %v447_v43  ;;  %v459_v27 = vmul.f32 %v440_v26, %v746_v51  ;;  %v460_v30 = vmul.f32 %v440_v26, %v751_v54  ;;  %v461_v33 = vmul.f32 %v440_v26, %v756_v57 }
 0x228   : > { %480 = vst.msk [vmem:[%s826_s24 + $0x38] sm:$0xff] %vm203_vm2, %v448_v44  ;;  %481 = vst.msk [vmem:[%s826_s24 + $0x40] sm:$0xff] %vm203_vm2, %v449_v2  ;;  %v462_v36 = vmul.f32 %v440_v26, %v761_v60  ;;  %v463_v39 = vmul.f32 %v440_v26, %v766_v63  ;;  %v464_v42 = vmul.f32 %v440_v26, %v771_v6 }
 0x229   : > { %482 = vst.msk [vmem:[%s826_s24 + $0x48] sm:$0xff] %vm203_vm2, %v450_v3  ;;  %483 = vst.msk [vmem:[%s826_s24 + $0x50] sm:$0xff] %vm203_vm2, %v451_v4  ;;  %v465_v45 = vmul.f32 %v440_v26, %v776_v10  ;;  %v466_v48 = vmul.f32 %v440_v26, %v781_v14  ;;  %v467_v51 = vmul.f32 %v440_v26, %v786_v19 }
 0x22a   : > { %484 = vst.msk [vmem:[%s826_s24 + $0x58] sm:$0xff] %vm203_vm2, %v452_v5  ;;  %485 = vst.msk [vmem:[%s826_s24 + $0x60] sm:$0xff] %vm203_vm2, %v453_v9  ;;  %v468_v54 = vmul.f32 %v440_v26, %v791_v23  ;;  %v469_v57 = vmul.f32 %v440_v26, %v796_v28  ;;  %v470_v60 = vmul.f32 %v440_v26, %v801_v32 }
 0x22b   : > { %486 = vst.msk [vmem:[%s826_s24 + $0x68] sm:$0xff] %vm203_vm2, %v454_v12  ;;  %487 = vst.msk [vmem:[%s826_s24 + $0x70] sm:$0xff] %vm203_vm2, %v455_v15  ;;  %v471_v63 = vmul.f32 %v440_v26, %v806_v37  ;;  %v472_v6 = vmul.f32 %v440_v26, %v811_v41 }
 0x22c   : > { %488 = vst.msk [vmem:[%s826_s24 + $0x78] sm:$0xff] %vm203_vm2, %v456_v18  ;;  %489 = vst.msk [vmem:[%s826_s24 + $0x80] sm:$0xff] %vm203_vm2, %v457_v21 }
 0x22d   : > { %490 = vst.msk [vmem:[%s826_s24 + $0x88] sm:$0xff] %vm203_vm2, %v458_v24  ;;  %491 = vst.msk [vmem:[%s826_s24 + $0x90] sm:$0xff] %vm203_vm2, %v459_v27 }
 0x22e   : > { %492 = vst.msk [vmem:[%s826_s24 + $0x98] sm:$0xff] %vm203_vm2, %v460_v30  ;;  %493 = vst.msk [vmem:[%s826_s24 + $0xa0] sm:$0xff] %vm203_vm2, %v461_v33 }
 0x22f   : > { %494 = vst.msk [vmem:[%s826_s24 + $0xa8] sm:$0xff] %vm203_vm2, %v462_v36  ;;  %495 = vst.msk [vmem:[%s826_s24 + $0xb0] sm:$0xff] %vm203_vm2, %v463_v39 }
 0x230   : > { %496 = vst.msk [vmem:[%s826_s24 + $0xb8] sm:$0xff] %vm203_vm2, %v464_v42  ;;  %497 = vst.msk [vmem:[%s826_s24 + $0xc0] sm:$0xff] %vm203_vm2, %v465_v45 }
 0x231   : > { %498 = vst.msk [vmem:[%s826_s24 + $0xc8] sm:$0xff] %vm203_vm2, %v466_v48  ;;  %499 = vst.msk [vmem:[%s826_s24 + $0xd0] sm:$0xff] %vm203_vm2, %v467_v51 }
 0x232   : > { %500 = vst.msk [vmem:[%s826_s24 + $0xd8] sm:$0xff] %vm203_vm2, %v468_v54  ;;  %501 = vst.msk [vmem:[%s826_s24 + $0xe0] sm:$0xff] %vm203_vm2, %v469_v57 }
 0x233   : > { %502 = vst.msk [vmem:[%s826_s24 + $0xe8] sm:$0xff] %vm203_vm2, %v470_v60  ;;  %503 = vst.msk [vmem:[%s826_s24 + $0xf0] sm:$0xff] %vm203_vm2, %v471_v63 }
 0x234   : > { %504 = vst.msk [vmem:[%s826_s24 + $0xf8] sm:$0xff] %vm203_vm2, %v472_v6 }
 0x235 PF: > { %s13_s12 = sadd.s32 1, %s612_s12  }
 0x236   : > { %p10_p4 = scmp.ge.s32.totalorder %s13_s12, 4  }
 0x238   :  { %12 = sbr.rel (!%p10_p4) target bundleno = 1 (0x1), region = 62 }

</bundles_post_ra>
